<compile_context>
chip_gen: v5e
topology: v5e:2x2
jax: 0.10.0
libtpu: 0.0.40
codegen_flags: <defaults>
</compile_context>

<pallas_src>
import jax
import jax.numpy as jnp
import numpy as np
from jax.experimental import pallas as pl
from jax.experimental.pallas import tpu as pltpu

B = 8        # rows per policy evaluation; softmax(dim=0) couples exactly these rows
IN_F = 4     # CartPole observation size
HID = 128
OUT_F = 2
MAX_TILE_N = 512   # instances per grid step, sized for v7x's 32 MiB scoped VMEM


def _policy_kernel(x_ref, w1_ref, b1_ref, w2_ref, b2_ref, out_ref):
    """One block = G independent policy evaluations, fused.

    x_ref   : (G*B, IN_F)   -- G instances flattened along the sublane axis
    out_ref : (G, B, OUT_F)
    """
    g, b, o = out_ref.shape
    # fc1 -> relu -> fc2: one big-M MXU chain over all G*B rows of the block.
    h = jnp.dot(x_ref[...], w1_ref[...],
                preferred_element_type=jnp.float32) + b1_ref[...]
    h = jnp.maximum(h, 0.0)
    logits = jnp.dot(h, w2_ref[...],
                     preferred_element_type=jnp.float32) + b2_ref[...]
    # Regroup rows by instance; B == 8 matches the sublane tile so this reshape
    # is a layout no-op.  Softmax over dim 0 of each instance (axis=1 here).
    lg = logits.reshape(g, b, o)
    m = jnp.max(lg, axis=1, keepdims=True)
    e = jnp.exp(lg - m)
    denom = jnp.sum(e, axis=1, keepdims=True)
    # exact reciprocal (approx=True would relax the 1e-5 tolerance)
    out_ref[...] = (e * pl.reciprocal(denom, approx=False)).astype(out_ref.dtype)


def policy_forward_batched(x, w1, b1, w2, b2, *, max_tile_n=MAX_TILE_N):
    """x: (N, B, IN_F) -> (N, B, OUT_F).  N independent `Policy.forward` calls
    fused into a single pallas_call; softmax(dim=0) stays confined to each
    (B, OUT_F) instance, matching torch."""
    x = jnp.asarray(x, jnp.float32)
    N, b, f = x.shape
    if f != IN_F:
        raise ValueError(f"expected trailing dim {IN_F}, got {f}")

    flops = 2 * N * b * (IN_F * HID + HID * OUT_F)
    transcendentals = N * b * OUT_F + N * OUT_F           # exps + reciprocals
    bytes_accessed = int(4 * (x.size + w1.size + b1.size + w2.size + b2.size
                              + N * b * OUT_F))
    cost = pl.CostEstimate(flops=flops, transcendentals=transcendentals,
                           bytes_accessed=bytes_accessed)

    if N <= max_tile_n:
        # Small N: drop the grid entirely — one VMEM-resident slab, zero
        # per-step pipeline overhead.
        vmem = pl.BlockSpec(memory_space=pltpu.MemorySpace.VMEM)
        return pl.pallas_call(
            _policy_kernel,
            out_shape=jax.ShapeDtypeStruct((N, b, OUT_F), jnp.float32),
            in_specs=[vmem, vmem, vmem, vmem, vmem],
            out_specs=vmem,
            cost_estimate=cost,
        )(x.reshape(N * b, IN_F), w1, b1, w2, b2)

    # Large N: TILE_N instances per grid step; pad N up to a tile multiple
    # (padded instances are finite garbage and sliced off below).
    tile_n = max_tile_n
    grid_len = pl.cdiv(N, tile_n)
    n_pad = grid_len * tile_n
    if n_pad != N:
        x = jnp.pad(x, ((0, n_pad - N), (0, 0), (0, 0)))
    tile_m = tile_n * b
    x2d = x.reshape(n_pad * b, IN_F)      # free row-major leading-dim merge

    out = pl.pallas_call(
        _policy_kernel,
        out_shape=jax.ShapeDtypeStruct((n_pad, b, OUT_F), jnp.float32),
        grid=(grid_len,),
        in_specs=[
            pl.BlockSpec((tile_m, IN_F), lambda i: (i, 0)),
            # Weights/biases: constant index maps -> DMA'd once, VMEM-resident
            # across the whole grid.
            pl.BlockSpec(w1.shape, lambda i: (0, 0)),
            pl.BlockSpec(b1.shape, lambda i: (0, 0)),
            pl.BlockSpec(w2.shape, lambda i: (0, 0)),
            pl.BlockSpec(b2.shape, lambda i: (0, 0)),
        ],
        out_specs=pl.BlockSpec((tile_n, b, OUT_F), lambda i: (i, 0, 0)),
        compiler_params=pltpu.CompilerParams(
            dimension_semantics=("parallel",)),   # grid_len >= 2 here -> megacore
        cost_estimate=cost,
    )(x2d, w1, b1, w2, b2)
    return out[:N]


def policy_forward(x, w1, b1, w2, b2):
    """Single forward on one (B, IN_F) batch of states (softmax over dim 0),
    routed through the batched kernel with N=1."""
    return policy_forward_batched(x[None], w1, b1, w2, b2)[0]


def init_params(key):
    """Deterministic init mimicking torch.nn.Linear default U(-1/sqrt(fan_in), ...)."""
    k1, k2, k3, k4 = jax.random.split(key, 4)
    bound1 = 1.0 / np.sqrt(float(IN_F))
    bound2 = 1.0 / np.sqrt(float(HID))
    w1 = jax.random.uniform(k1, (IN_F, HID), jnp.float32, -bound1, bound1)
    b1 = jax.random.uniform(k2, (1, HID), jnp.float32, -bound1, bound1)
    w2 = jax.random.uniform(k3, (HID, OUT_F), jnp.float32, -bound2, bound2)
    b2 = jax.random.uniform(k4, (1, OUT_F), jnp.float32, -bound2, bound2)
    return w1, b1, w2, b2


def reference_forward(x, w1, b1, w2, b2):
    h = jnp.maximum(x @ w1 + b1, 0.0)
    logits = h @ w2 + b2
    return jax.nn.softmax(logits, axis=0)


# TODO(synk): train_net (REINFORCE loss + Adam step) and Categorical sampling
# are training-time host logic, not part of the forward pass — not implemented.

if __name__ == "__main__":
    key = jax.random.PRNGKey(0)
    kx, kxb, kxl, kp = jax.random.split(key, 4)
    w1, b1, w2, b2 = init_params(kp)

    # 1) single instance: (8, 4) batch of CartPole states, softmax over dim 0
    x = jax.random.normal(kx, (B, IN_F), jnp.float32)
    out = jax.block_until_ready(policy_forward(x, w1, b1, w2, b2))
    ref = reference_forward(x, w1, b1, w2, b2)
    np.testing.assert_allclose(np.asarray(out), np.asarray(ref),
                               rtol=1e-5, atol=1e-5)

    # 2) small amortized batch -> gridless single-slab path
    N_small = 16
    xb = jax.random.normal(kxb, (N_small, B, IN_F), jnp.float32)
    outb = jax.block_until_ready(policy_forward_batched(xb, w1, b1, w2, b2))
    refb = jax.vmap(lambda xi: reference_forward(xi, w1, b1, w2, b2))(xb)
    np.testing.assert_allclose(np.asarray(outb), np.asarray(refb),
                               rtol=1e-5, atol=1e-5)

    # 3) larger batch with a small forced tile -> exercises the gridded path,
    #    remainder padding, weight-resident index maps and the parallel axis.
    N_large = 160
    xl = jax.random.normal(kxl, (N_large, B, IN_F), jnp.float32)
    outl = jax.block_until_ready(
        policy_forward_batched(xl, w1, b1, w2, b2, max_tile_n=64))
    refl = jax.vmap(lambda xi: reference_forward(xi, w1, b1, w2, b2))(xl)
    np.testing.assert_allclose(np.asarray(outl), np.asarray(refl),
                               rtol=1e-5, atol=1e-5)

    print("KERNEL_OK")
</pallas_src>

<mosaic_0001>
module attributes {stable_mosaic.version = 11 : i64} {
  func.func @_policy_kernel(%arg0: memref<8x4xf32, #tpu.memory_space<vmem>>, %arg1: memref<4x128xf32, #tpu.memory_space<vmem>>, %arg2: memref<1x128xf32, #tpu.memory_space<vmem>>, %arg3: memref<128x2xf32, #tpu.memory_space<vmem>>, %arg4: memref<1x2xf32, #tpu.memory_space<vmem>>, %arg5: memref<1x8x2xf32, #tpu.memory_space<vmem>>) attributes {dimension_semantics = [], scalar_prefetch = 0 : i64, scratch_operands = 0 : i64, tpu.core_type = #tpu.core_type<tc>} {
    %c0 = arith.constant 0 : index
    %c0_0 = arith.constant 0 : index
    %0 = vector.load %arg0[%c0, %c0_0] : memref<8x4xf32, #tpu.memory_space<vmem>>, vector<8x4xf32>
    %c0_1 = arith.constant 0 : index
    %c0_2 = arith.constant 0 : index
    %1 = vector.load %arg1[%c0_1, %c0_2] : memref<4x128xf32, #tpu.memory_space<vmem>>, vector<4x128xf32>
    %cst = arith.constant dense<0.000000e+00> : vector<8x128xf32>
    %2 = tpu.matmul %0, %1, %cst {dimension_numbers = #tpu.dot_dimension_numbers<[1], [0], [0], [1], [0, 0, 1, 1], [], []>} : vector<8x4xf32>, vector<4x128xf32>, vector<8x128xf32> -> vector<8x128xf32>
    %c0_3 = arith.constant 0 : index
    %c0_4 = arith.constant 0 : index
    %3 = vector.load %arg2[%c0_3, %c0_4] : memref<1x128xf32, #tpu.memory_space<vmem>>, vector<1x128xf32>
    %4 = vector.broadcast %3 : vector<1x128xf32> to vector<8x128xf32>
    %5 = arith.addf %2, %4 : vector<8x128xf32>
    %cst_5 = arith.constant 0.000000e+00 : f32
    %6 = vector.broadcast %cst_5 : f32 to vector<8x128xf32>
    %7 = arith.maximumf %5, %6 : vector<8x128xf32>
    %c0_6 = arith.constant 0 : index
    %c0_7 = arith.constant 0 : index
    %8 = vector.load %arg3[%c0_6, %c0_7] : memref<128x2xf32, #tpu.memory_space<vmem>>, vector<128x2xf32>
    %cst_8 = arith.constant dense<0.000000e+00> : vector<8x2xf32>
    %9 = tpu.matmul %7, %8, %cst_8 {dimension_numbers = #tpu.dot_dimension_numbers<[1], [0], [0], [1], [0, 0, 1, 1], [], []>} : vector<8x128xf32>, vector<128x2xf32>, vector<8x2xf32> -> vector<8x2xf32>
    %c0_9 = arith.constant 0 : index
    %c0_10 = arith.constant 0 : index
    %10 = vector.load %arg4[%c0_9, %c0_10] : memref<1x2xf32, #tpu.memory_space<vmem>>, vector<1x2xf32>
    %11 = vector.broadcast %10 : vector<1x2xf32> to vector<8x2xf32>
    %12 = arith.addf %9, %11 : vector<8x2xf32>
    %13 = vector.shape_cast %12 : vector<8x2xf32> to vector<1x8x2xf32>
    %cst_11 = arith.constant dense<0xFF800000> : vector<1x2xf32>
    %14 = vector.multi_reduction <maximumf>, %13, %cst_11 [1] : vector<1x8x2xf32> to vector<1x2xf32>
    %15 = vector.shape_cast %14 : vector<1x2xf32> to vector<1x1x2xf32>
    %16 = vector.broadcast %15 : vector<1x1x2xf32> to vector<1x8x2xf32>
    %17 = arith.subf %13, %16 : vector<1x8x2xf32>
    %18 = math.exp %17 : vector<1x8x2xf32>
    %cst_12 = arith.constant dense<0.000000e+00> : vector<1x2xf32>
    %19 = vector.multi_reduction <add>, %18, %cst_12 [1] : vector<1x8x2xf32> to vector<1x2xf32>
    %20 = vector.shape_cast %19 : vector<1x2xf32> to vector<1x1x2xf32>
    %21 = tpu.reciprocal %20 : vector<1x1x2xf32> -> vector<1x1x2xf32>
    %22 = vector.broadcast %21 : vector<1x1x2xf32> to vector<1x8x2xf32>
    %23 = arith.mulf %18, %22 : vector<1x8x2xf32>
    %c0_13 = arith.constant 0 : index
    %c0_14 = arith.constant 0 : index
    %c0_15 = arith.constant 0 : index
    %24 = vector.load %arg5[%c0_13, %c0_14, %c0_15] : memref<1x8x2xf32, #tpu.memory_space<vmem>>, vector<1x8x2xf32>
    tpu.vector_store %arg5[%c0_13, %c0_14, %c0_15], %23 {strides = array<i32>} : memref<1x8x2xf32, #tpu.memory_space<vmem>>, vector<1x8x2xf32>,
    return
  }
}

</mosaic_0001>

<bundles_post_ra>
// kernel: tpu_custom_call.1
= control target key start
LH: loop header
LB: loop body
LE: loop exit
PB: predicated region body
PF: predicated region fallthrough
CT: control target
= control target key end

     0   :  { %vm30_vm0 = vcmask 1043456   ;;  %vm26_vm1 = vcmask 31744   ;;  %vm95_vm2 = vcmask 15360   ;;  %s237_s1 = inlined_call_operand.vmem [shape: f32[4,128], index: 1, kind: input, shape index: {}]   ;;  %s238_s0 = inlined_call_operand.vmem [shape: f32[8,4], index: 0, kind: input, shape index: {}]   ;;  %s239_s3 = inlined_call_operand.vmem [shape: f32[128,2], index: 3, kind: input, shape index: {}]   ;;  %s240_s2 = inlined_call_operand.vmem [shape: f32[1,128], index: 2, kind: input, shape index: {}]   ;;  %s241_s4 = inlined_call_operand.vmem [shape: f32[1,2], index: 4, kind: input, shape index: {}]   ;;  %s242_s5 = inlined_call_operand.vmem [shape: f32[1,8,2], index: 5, kind: output, shape index: {}]  }
   0x1   :  { %v21_v0 = vld [vmem:[%s237_s1] sm:$0xf]  ;;  %v70_v2 = vld [vmem:[%s239_s3 + $0x78] sm:$0xff]  ;;  %v69_v3 = vld [vmem:[%s239_s3 + $0x70] sm:$0xff] }
   0x2   :  { %v20_v1 = vld [vmem:[%s238_s0] sm:$0xff]  ;;  %133 = vmatpush.msk.msra.mxu0 %vm30_vm0, %v21_v0  ;;  %75 = vmatpush.msra.mxu1 %v70_v2  ;;  %v68_v4 = vld [vmem:[%s239_s3 + $0x68] sm:$0xff]  ;;  %v66_v6 = vld [vmem:[%s239_s3 + $0x58] sm:$0xff] }
   0x3   :  { %134 = vmatmul.msk.f32.vlgmr.msra.gmra.mxu0 %vm26_vm1, %v20_v1  ;;  %v67_v5 = vld [vmem:[%s239_s3 + $0x60] sm:$0xff]  ;;  %v65_v7 = vld [vmem:[%s239_s3 + $0x50] sm:$0xff]  ;;  %v64_v8 = vld [vmem:[%s239_s3 + $0x48] sm:$0xff] }
   0x4   :  { %76 = vmatpush.msra.mxu1 %v69_v3  ;;  %v63_v9 = vld [vmem:[%s239_s3 + $0x40] sm:$0xff]  ;;  %v62_v10 = vld [vmem:[%s239_s3 + $0x38] sm:$0xff]  ;;  %v61_v11 = vld [vmem:[%s239_s3 + $0x30] sm:$0xff] }
   0x5   :  { %v60_v12 = vld [vmem:[%s239_s3 + $0x28] sm:$0xff]  ;;  %v59_v13 = vld [vmem:[%s239_s3 + $0x20] sm:$0xff]  ;;  %v58_v14 = vld [vmem:[%s239_s3 + $0x18] sm:$0xff] }
   0x6   :  { %77 = vmatpush.msra.mxu1 %v68_v4  ;;  %v57_v15 = vld [vmem:[%s239_s3 + $0x10] sm:$0xff]  ;;  %v56_v16 = vld [vmem:[%s239_s3 + $0x8] sm:$0xff]  ;;  %v55_v17 = vld [vmem:[%s239_s3] sm:$0xff] }
   0x7   :  { %v135_v18 = vld [vmem:[%s240_s2] ss:$0 sm:$0xff] }
   0x8   :  { %78 = vmatpush.msra.mxu1 %v67_v5  ;;  %v136_v22 = vld [vmem:[%s241_s4] ss:$0 sm:$0xff] }
   0xa   :  { %79 = vmatpush.msra.mxu1 %v66_v6 }
   0xc   :  { %80 = vmatpush.msra.mxu1 %v65_v7 }
   0xe   :  { %81 = vmatpush.msra.mxu1 %v64_v8 }
  0x10   :  { %82 = vmatpush.msra.mxu1 %v63_v9 }
  0x12   :  { %83 = vmatpush.msra.mxu1 %v62_v10 }
  0x14   :  { %84 = vmatpush.msra.mxu1 %v61_v11 }
  0x16   :  { %85 = vmatpush.msra.mxu1 %v60_v12 }
  0x18   :  { %86 = vmatpush.msra.mxu1 %v59_v13 }
  0x1a   :  { %87 = vmatpush.msra.mxu1 %v58_v14 }
  0x1c   :  { %88 = vmatpush.msra.mxu1 %v57_v15 }
  0x1e   :  { %89 = vmatpush.msra.mxu1 %v56_v16 }
  0x20   :  { %90 = vmatpush.msra.mxu1 %v55_v17 }
  0x80   :  { %v51_v19 = vpop.f32.mrf.mxu0 }
  0x81   :  { %v52_v20 = vadd.f32 %v135_v18, %v51_v19 }
  0x83   :  { %v54_v21 = vmax.f32 %v52_v20, 0.0 }
  0x85   :  { %91 = vmatmul.f32.vlgmr.msra.gmra.mxu1 %v54_v21 }
 0x102   :  { %v92_v23 = vpop.f32.mrf.mxu1 }
 0x103   :  { %v93_v24 = vadd.f32 %v136_v22, %v92_v23 }
 0x105   :  { %v96_v25 = vsel %vm95_vm2, %v93_v24, -inf }
 0x106   :  { %v97_v26 = vrot.slane %v96_v25, 4 }
 0x108   :  { %v98_v27 = vmax.f32 %v96_v25, %v97_v26 }
 0x10a   :  { %v99_v28 = vrot.slane %v98_v27, 2 }
 0x10c   :  { %v100_v29 = vmax.f32 %v98_v27, %v99_v28 }
 0x10e   :  { %v101_v30 = vrot.slane %v100_v29, 1 }
 0x110   :  { %v102_v31 = vmax.f32 %v100_v29, %v101_v30 }
 0x112   :  { %v103_v32 = vsub.f32 %v93_v24, %v102_v31 }
 0x114   :  { %v104_v33 = vmul.f32 1.442695, %v103_v32 }
 0x116   :  { %137 = vpow2.f32 %v104_v33 }
 0x11c   :  { %v138_v34 = vpop.eup %137 }
 0x11d   :  { %v106_v35 = vsel %vm95_vm2, %v138_v34, 0.0 }
 0x11e   :  { %v107_v36 = vrot.slane %v106_v35, 4 }
 0x120   :  { %v108_v37 = vadd.f32 %v107_v36, %v106_v35 }
 0x122   :  { %v109_v38 = vrot.slane %v108_v37, 2 }
 0x124   :  { %v110_v39 = vadd.f32 %v109_v38, %v108_v37 }
 0x126   :  { %v111_v40 = vrot.slane %v110_v39, 1 }
 0x128   :  { %v112_v41 = vadd.f32 %v111_v40, %v110_v39 }
 0x12a   :  { %139 = vrcp.f32 %v112_v41  ;;  %v124_v45 = vand.u32 2147483648, %v112_v41  ;;  %v122_v47 = vand.u32 2147483647, %v112_v41  ;;  %vm118_vm4 = vweird.f32 %v112_v41 }
 0x12c   :  { %v125_v49 = vor.u32 1.1754944e-38, %v124_v45  ;;  %vm123_vm6 = vcmp.eq.f32.partialorder %v122_v47, 8.507059e+37 }
 0x130   :  { %v140_v42 = vpop.eup %139 }
 0x131   :  { %v114_v43 = vmul.f32 %v140_v42, %v112_v41  ;;  %vm119_vm3 = vweird.f32 %v140_v42 }
 0x132   :  { %vm120_vm5 = vmor %vm118_vm4, %vm119_vm3 }
 0x133   :  { %v115_v44 = vsub.f32 1.0, %v114_v43 }
 0x135   :  { %v116_v46 = vmul.f32 %v140_v42, %v115_v44 }
 0x137   :  { %v117_v48 = vadd.f32 %v140_v42, %v116_v46 }
 0x139   :  { %v121_v50 = vsel %vm120_vm5, %v140_v42, %v117_v48 }
 0x13a   :  { %v126_v51 = vsel %vm123_vm6, %v125_v49, %v121_v50 }
 0x13b   :  { %v127_v52 = vmul.f32 %v138_v34, %v126_v51 }
 0x13d   :  { %128 = vst.msk [vmem:[%s242_s5] sm:$0xff] %vm95_vm2, %v127_v52 }

</bundles_post_ra>
